<compile_context>
chip_gen: v7x
topology: tpu7x:2x2x1
jax: 0.10.0
libtpu: 0.0.40
codegen_flags: <defaults>
</compile_context>

<pallas_src>
import functools

import jax
import jax.numpy as jnp
import numpy as np
from jax.experimental import pallas as pl
from jax.experimental.pallas import tpu as pltpu


def _round_up(a, b):
    return ((a + b - 1) // b) * b


def _label_smoothing_kernel(pred_ref, tgt_ref, out_ref, *,
                            n_valid, confidence, off_value):
    tile_n, n_cls = pred_ref.shape

    logits = pred_ref[...]                                   # (tile_n, C) f32
    tgt = tgt_ref[...]                                       # (tile_n, 1) i32

    # Numerically stable log_softmax along the class (lane) axis.
    m = jnp.max(logits, axis=-1, keepdims=True)              # (tile_n, 1)
    shifted = logits - m
    lse = jnp.log(jnp.sum(jnp.exp(shifted), axis=-1, keepdims=True))
    logp = shifted - lse                                     # (tile_n, C)

    # Gather logp at the target class via a one-hot mask (no cross-lane gather).
    cls_ids = jax.lax.broadcasted_iota(jnp.int32, (tile_n, n_cls), 1)
    logp_t = jnp.sum(jnp.where(cls_ids == tgt, logp, jnp.float32(0.0)),
                     axis=-1, keepdims=True)                 # (tile_n, 1)
    sum_logp = jnp.sum(logp, axis=-1, keepdims=True)         # (tile_n, 1)

    # loss_n = -( confidence * logp_t + off_value * (sum_logp - logp_t) )
    loss = -(jnp.float32(confidence) * logp_t
             + jnp.float32(off_value) * (sum_logp - logp_t))  # (tile_n, 1)

    # Zero out rows that only exist due to batch padding.
    row = (pl.program_id(0) * tile_n
           + jax.lax.broadcasted_iota(jnp.int32, (tile_n, 1), 0))
    out_ref[...] = jnp.where(row < n_valid, loss, jnp.float32(0.0))


def label_smoothing_loss_pallas(pred, target, smoothing=0.2, tile_n=128):
    """Mean label-smoothing cross entropy, matching LabelSmoothingLoss.forward."""
    assert 0.0 <= smoothing < 1.0
    N, C = pred.shape
    confidence = 1.0 - smoothing
    off_value = smoothing / (C - 1)

    # Sublane-aligned tile; pad the batch so the grid divides evenly.
    tile_n = min(tile_n, _round_up(N, 8))
    n_pad = _round_up(N, tile_n)
    grid = (n_pad // tile_n,)

    pred_p = jnp.zeros((n_pad, C), jnp.float32).at[:N].set(
        pred.astype(jnp.float32))
    tgt_p = jnp.zeros((n_pad, 1), jnp.int32).at[:N, 0].set(
        target.astype(jnp.int32))

    kernel = functools.partial(_label_smoothing_kernel,
                               n_valid=N,
                               confidence=confidence,
                               off_value=off_value)

    per_row = pl.pallas_call(
        kernel,
        out_shape=jax.ShapeDtypeStruct((n_pad, 1), jnp.float32),
        grid=grid,
        in_specs=[pl.BlockSpec((tile_n, C), lambda i: (i, 0)),
                  pl.BlockSpec((tile_n, 1), lambda i: (i, 0))],
        out_specs=pl.BlockSpec((tile_n, 1), lambda i: (i, 0)),
        compiler_params=pltpu.CompilerParams(
            dimension_semantics=("parallel",)),
    )(pred_p, tgt_p)

    # Padded rows are zero inside the kernel; mean over the real batch.
    return jnp.sum(per_row) / N


def reference_loss(pred, target, smoothing=0.2):
    """Pure-JAX reference mirroring the PyTorch module."""
    N, C = pred.shape
    logp = jax.nn.log_softmax(pred.astype(jnp.float32), axis=-1)
    true_dist = jnp.full_like(logp, smoothing / (C - 1))
    true_dist = true_dist.at[jnp.arange(N), target].set(1.0 - smoothing)
    return jnp.mean(jnp.sum(-true_dist * logp, axis=-1))


if __name__ == "__main__":
    key = jax.random.PRNGKey(0)
    kp, kt = jax.random.split(key)
    N, C = 50, 16                      # exercises padding + a multi-tile grid
    pred = jax.random.normal(kp, (N, C), dtype=jnp.float32) * 3.0
    target = jax.random.randint(kt, (N,), 0, C, dtype=jnp.int32)

    loss = label_smoothing_loss_pallas(pred, target, smoothing=0.2, tile_n=16)
    loss = jax.block_until_ready(loss)

    ref = reference_loss(pred, target, smoothing=0.2)
    np.testing.assert_allclose(np.array(loss), np.array(ref),
                               rtol=1e-5, atol=1e-5)
    print("KERNEL_OK")
</pallas_src>

<mosaic_0001>
module attributes {stable_mosaic.version = 11 : i64} {
  func.func @_label_smoothing_kernel(%arg0: i32, %arg1: memref<16x16xf32, #tpu.memory_space<vmem>>, %arg2: memref<16x1xi32, #tpu.memory_space<vmem>>, %arg3: memref<16x1xf32, #tpu.memory_space<vmem>>) attributes {dimension_semantics = [#tpu.dimension_semantics<parallel>], iteration_bounds = array<i64: 4>, scalar_prefetch = 0 : i64, scratch_operands = 0 : i64, tpu.core_type = #tpu.core_type<tc>, window_params = [{transform_indices = @transform_0, window_bounds = array<i64: 16, 16>}, {transform_indices = @transform_1, window_bounds = array<i64: 16, 1>}, {transform_indices = @transform_2, window_bounds = array<i64: 16, 1>}]} {
    %c0 = arith.constant 0 : index
    %c0_0 = arith.constant 0 : index
    %0 = vector.load %arg1[%c0, %c0_0] : memref<16x16xf32, #tpu.memory_space<vmem>>, vector<16x16xf32>
    %c0_1 = arith.constant 0 : index
    %c0_2 = arith.constant 0 : index
    %1 = vector.load %arg2[%c0_1, %c0_2] : memref<16x1xi32, #tpu.memory_space<vmem>>, vector<16x1xi32>
    %cst = arith.constant dense<0xFF800000> : vector<16xf32>
    %2 = vector.multi_reduction <maximumf>, %0, %cst [1] : vector<16x16xf32> to vector<16xf32>
    %3 = vector.shape_cast %2 : vector<16xf32> to vector<16x1xf32>
    %4 = vector.broadcast %3 : vector<16x1xf32> to vector<16x16xf32>
    %5 = arith.subf %0, %4 : vector<16x16xf32>
    %6 = math.exp %5 : vector<16x16xf32>
    %cst_3 = arith.constant dense<0.000000e+00> : vector<16xf32>
    %7 = vector.multi_reduction <add>, %6, %cst_3 [1] : vector<16x16xf32> to vector<16xf32>
    %8 = vector.shape_cast %7 : vector<16xf32> to vector<16x1xf32>
    %9 = math.log %8 : vector<16x1xf32>
    %10 = vector.broadcast %9 : vector<16x1xf32> to vector<16x16xf32>
    %11 = arith.subf %5, %10 : vector<16x16xf32>
    %12 = tpu.iota {dimensions = array<i32: 1>} : vector<16x16xi32>
    %13 = vector.broadcast %1 : vector<16x1xi32> to vector<16x16xi32>
    %14 = arith.cmpi eq, %12, %13 : vector<16x16xi32>
    %cst_4 = arith.constant 0.000000e+00 : f32
    %15 = vector.broadcast %cst_4 : f32 to vector<16x16xf32>
    %16 = arith.select %14, %11, %15 : vector<16x16xi1>, vector<16x16xf32>
    %cst_5 = arith.constant dense<0.000000e+00> : vector<16xf32>
    %17 = vector.multi_reduction <add>, %16, %cst_5 [1] : vector<16x16xf32> to vector<16xf32>
    %18 = vector.shape_cast %17 : vector<16xf32> to vector<16x1xf32>
    %cst_6 = arith.constant dense<0.000000e+00> : vector<16xf32>
    %19 = vector.multi_reduction <add>, %11, %cst_6 [1] : vector<16x16xf32> to vector<16xf32>
    %20 = vector.shape_cast %19 : vector<16xf32> to vector<16x1xf32>
    %cst_7 = arith.constant 8.000000e-01 : f32
    %21 = vector.broadcast %cst_7 : f32 to vector<16x1xf32>
    %22 = arith.mulf %21, %18 : vector<16x1xf32>
    %23 = arith.subf %20, %18 : vector<16x1xf32>
    %cst_8 = arith.constant 0.0133333337 : f32
    %24 = vector.broadcast %cst_8 : f32 to vector<16x1xf32>
    %25 = arith.mulf %24, %23 : vector<16x1xf32>
    %26 = arith.addf %22, %25 : vector<16x1xf32>
    %cst_9 = arith.constant 0.000000e+00 : f32
    %27 = vector.broadcast %cst_9 : f32 to vector<16x1xf32>
    %28 = arith.subf %27, %26 : vector<16x1xf32>
    %c16_i32 = arith.constant 16 : i32
    %29 = arith.muli %arg0, %c16_i32 : i32
    %30 = tpu.iota {dimensions = array<i32: 0>} : vector<16x1xi32>
    %31 = vector.broadcast %29 : i32 to vector<16x1xi32>
    %32 = arith.addi %31, %30 : vector<16x1xi32>
    %c50_i32 = arith.constant 50 : i32
    %33 = vector.broadcast %c50_i32 : i32 to vector<16x1xi32>
    %34 = arith.cmpi slt, %32, %33 : vector<16x1xi32>
    %cst_10 = arith.constant 0.000000e+00 : f32
    %35 = vector.broadcast %cst_10 : f32 to vector<16x1xf32>
    %36 = arith.select %34, %28, %35 : vector<16x1xi1>, vector<16x1xf32>
    %c0_11 = arith.constant 0 : index
    %c0_12 = arith.constant 0 : index
    %37 = vector.load %arg3[%c0_11, %c0_12] : memref<16x1xf32, #tpu.memory_space<vmem>>, vector<16x1xf32>
    tpu.vector_store %arg3[%c0_11, %c0_12], %36 {strides = array<i32>} : memref<16x1xf32, #tpu.memory_space<vmem>>, vector<16x1xf32>,
    return
  }
  func.func @transform_0(%arg0: i32) -> (i32, i32) {
    %c0_i32 = arith.constant 0 : i32
    %c0_i32_0 = arith.constant 0 : i32
    return %arg0, %c0_i32 : i32, i32
  }
  func.func @transform_1(%arg0: i32) -> (i32, i32) {
    %c0_i32 = arith.constant 0 : i32
    %c0_i32_0 = arith.constant 0 : i32
    return %arg0, %c0_i32 : i32, i32
  }
  func.func @transform_2(%arg0: i32) -> (i32, i32) {
    %c0_i32 = arith.constant 0 : i32
    %c0_i32_0 = arith.constant 0 : i32
    return %arg0, %c0_i32 : i32, i32
  }
}

</mosaic_0001>

<bundles_post_ra>
// kernel: tpu_custom_call.1
= control target key start
LH: loop header
LB: loop body
LE: loop exit
PB: predicated region body
PF: predicated region fallthrough
CT: control target
= control target key end

     0   :  { %s371_s9 = smov 0   ;;  %s408_s0 = inlined_call_operand.vmem [shape: f32[64,16], index: 0, kind: input, shape index: {}]   ;;  %s409_s1 = inlined_call_operand.vmem [shape: s32[64,1], index: 1, kind: input, shape index: {}]   ;;  %s410_s2 = inlined_call_operand.vmem [shape: f32[64,1], index: 2, kind: output, shape index: {}]  }
   0x1 LB: > { %s314_s10 = sadd.s32 4294967295, %s353_s9   ;;  %p318_p0 = scmp.ge.s32.totalorder %s353_s9, 1  ;;  %s353_s9 = sphi %s371_s9, %s12_s9  }
   0x2   : > { %p124_p1 = scmp.lt.s32.totalorder %s353_s9, 5 }
   0x4   : > { %p125_p2 = pnand %p318_p0, %p124_p1 }
   0x5   : > { %s319_s11 = sshll.u32 (!%p125_p2), %s314_s10, 1  ;;  %vm173_vm0 = vcmask (!%p125_p2), 130048   ;;  %v355_v4 = vmov (!%p125_p2), 0   ;;  %v198_v19 = vlaneseq (!%p125_p2)  ;;  %s325_s19 = sshll.u32 (!%p125_p2), %s314_s10, 4  ;;  %vm243_vm4 = vcmask (!%p125_p2), 7168  }
   0x6   : > { %128 = sbr.rel (%p125_p2) target bundleno = 495 (0x1ef), region = 28  ;;  %p152_p3 = scmp.lt.s32.totalorder (!%p125_p2), %s319_s11, 7  ;;  %337 = vset.pattern.permute.xlu0 (!%p125_p2), %v355_v4  ;;  %338 = vset.pattern.permute.xlu1 (!%p125_p2), %v355_v4  ;;  %v236_v37 = vstv (!%p125_p2), %s325_s19 }
   0x7   : > { %v199_v20 = vand.u32 (!%p125_p2), 127, %v198_v19  ;;  %v234_v35 = vshrl.u32 (!%p125_p2), %v198_v19, 7 }
   0x9   : > { %v237_v40 = vadd.s32 (!%p125_p2), %v236_v37, %v234_v35  ;;  %v235_v45 = vadd.s32 (!%p125_p2), 8, %v234_v35 }
   0xb   : > { %vm239_vm3 = vcmp.lt.s32.totalorder (!%p125_p2), %v237_v40, 50  ;;  %v238_v50 = vadd.s32 (!%p125_p2), %v236_v37, %v235_v45 }
   0xd   : > { %s412_s11 = smov (!%p152_p3, %s319_s11), 7  ;;  %vm240_vm5 = vcmp.lt.s32.totalorder %v238_v50, 50 }
   0xe   : > { %s381_s12 = sshll.u32 %s412_s11, 3 }
   0xf   : > { %s155_s15 = scalar_lea.vmem %s408_s0, %s381_s12  ;;  %s161_s18 = scalar_lea.vmem %s409_s1, %s381_s12 }
  0x10   : > { %v169_v0 = vld [vmem:[%s155_s15] sm:$0xff]  ;;  %v170_v1 = vld [vmem:[%s155_s15 + $0x8] sm:$0xff]  ;;  %s167_s22 = scalar_lea.vmem %s410_s2, %s381_s12 }
  0x11   : > { %v174_v2 = vsel %vm173_vm0, %v169_v0, -inf  ;;  %v177_v3 = vsel %vm173_vm0, %v170_v1, -inf  ;;  %v171_v5 = vld [vmem:[%s161_s18] sm:$0xff]  ;;  %v172_v16 = vld [vmem:[%s161_s18 + $0x8] sm:$0xff] }
  0x12   : > { %175 = vmax.xlane.f32.xlu0 %v174_v2 }
  0x16   : > { %178 = vmax.xlane.f32.xlu0 %v177_v3 }
  0x2c   : > { %201 = vperm.xlu0 %337, %v171_v5  }
  0x9f   : > { %v176_v6 = vpop.xlane.xlu0 %175 }
  0xa0   : > { %v180_v7 = vsub.f32 %v169_v0, %v176_v6 }
  0xa2   : > { %v182_v8 = vmul.f32 1.442695, %v180_v7 }
  0xa3   : > { %v179_v9 = vpop.xlane.xlu0 %178 }
  0xa4   : > { %339 = vpow2.f32 %v182_v8  ;;  %v181_v10 = vsub.f32 %v170_v1, %v179_v9 }
  0xa6   : > { %v184_v11 = vmul.f32 1.442695, %v181_v10 }
  0xa8   : > { %341 = vpow2.f32 %v184_v11 }
  0xab   : > { %v202_v21 = vpop.permute.xlu0 %201 }
  0xac   : > { %vm206_vm1 = vcmp.eq.s32.totalorder %v199_v20, %v202_v21 }
  0xae   : > { %v340_v12 = vpop.eup %339 }
  0xaf   : > { %v186_v13 = vsel %vm173_vm0, %v340_v12, 0.0 }
  0xb0   : > { %187 = vadd.xlane.f32.xlu1 %v186_v13 }
  0xb2   : > { %v342_v14 = vpop.eup %341 }
  0xb3   : > { %v189_v15 = vsel %vm173_vm0, %v342_v14, 0.0 }
  0xb4   : > { %190 = vadd.xlane.f32.xlu1 %v189_v15 }
  0xc5   : > { %204 = vperm.xlu1 %338, %v172_v16  }
 0x13d   : > { %v188_v17 = vpop.xlane.xlu1 %187 }
 0x13e   : > { %343 = vlog2.f32 %v188_v17 }
 0x141   : > { %v191_v18 = vpop.xlane.xlu1 %190 }
 0x142   : > { %345 = vlog2.f32 %v191_v18 }
 0x145   : > { %v205_v25 = vpop.permute.xlu1 %204 }
 0x146   : > { %vm207_vm2 = vcmp.eq.s32.totalorder %v199_v20, %v205_v25 }
 0x148   : > { %v344_v22 = vpop.eup %343 }
 0x149   : > { %v193_v23 = vmul.f32 0.6931472, %v344_v22 }
 0x14b   : > { %v196_v24 = vsub.f32 %v180_v7, %v193_v23 }
 0x14c   : > { %v346_v26 = vpop.eup %345 }
 0x14d   : > { %v195_v27 = vmul.f32 0.6931472, %v346_v26  ;;  %v216_v28 = vsel %vm173_vm0, %v196_v24, 0.0  ;;  %v208_v29 = vsel %vm206_vm1, %v196_v24, 0.0 }
 0x14e   : > { %217 = vadd.xlane.f32.xlu0 %v216_v28  ;;  %v210_v30 = vsel %vm173_vm0, %v208_v29, 0.0 }
 0x14f   : > { %211 = vadd.xlane.f32.xlu1 %v210_v30  ;;  %v197_v31 = vsub.f32 %v181_v10, %v195_v27 }
 0x151   : > { %v209_v32 = vsel %vm207_vm2, %v197_v31, 0.0  ;;  %v219_v34 = vsel %vm173_vm0, %v197_v31, 0.0 }
 0x152   : > { %v213_v33 = vsel %vm173_vm0, %v209_v32, 0.0 }
 0x153   : > { %214 = vadd.xlane.f32.xlu1 %v213_v33 }
 0x157   : > { %220 = vadd.xlane.f32.xlu1 %v219_v34 }
 0x1db   : > { %v218_v36 = vpop.xlane.xlu0 %217 }
 0x1dc   : > { %v212_v38 = vpop.xlane.xlu1 %211 }
 0x1dd   : > { %v224_v39 = vsub.f32 %v218_v36, %v212_v38  ;;  %v222_v41 = vmul.f32 0.8, %v212_v38 }
 0x1df   : > { %v226_v42 = vmul.f32 0.013333334, %v224_v39 }
 0x1e0   : > { %v215_v43 = vpop.xlane.xlu1 %214 }
 0x1e1   : > { %v228_v44 = vadd.f32 %v226_v42, %v222_v41  ;;  %v223_v51 = vmul.f32 0.8, %v215_v43 }
 0x1e3   : > { %v230_v46 = vsub.f32 0.0, %v228_v44 }
 0x1e4   : > { %v221_v47 = vpop.xlane.xlu1 %220 }
 0x1e5   : > { %v241_v48 = vsel %vm239_vm3, %v230_v46, 0.0  ;;  %v225_v49 = vsub.f32 %v221_v47, %v215_v43 }
 0x1e6   : > { %244 = vst.msk [vmem:[%s167_s22] sm:$0xff] %vm243_vm4, %v241_v48 }
 0x1e7   : > { %v227_v52 = vmul.f32 0.013333334, %v225_v49 }
 0x1e9   : > { %v229_v53 = vadd.f32 %v227_v52, %v223_v51 }
 0x1eb   : > { %v231_v54 = vsub.f32 0.0, %v229_v53 }
 0x1ed   : > { %v242_v55 = vsel %vm240_vm5, %v231_v54, 0.0 }
 0x1ee   : > { %245 = vst.msk [vmem:[%s167_s22 + $0x8] sm:$0xff] %vm243_vm4, %v242_v55 }
 0x1ef PF: > { %s12_s9 = sadd.s32 1, %s353_s9  }
 0x1f0   : > { %p9_p4 = scmp.ge.s32.totalorder %s12_s9, 6  }
 0x1f2   :  { %11 = sbr.rel (!%p9_p4) target bundleno = 1 (0x1), region = 61 }

</bundles_post_ra>
